<compile_context>
chip_gen: v7x
topology: tpu7x:2x2x1
jax: 0.10.0
libtpu: 0.0.40
codegen_flags: <defaults>
</compile_context>

<pallas_src>
import functools

import jax
import jax.numpy as jnp
from jax.experimental import pallas as pl
from jax.experimental.pallas import tpu as pltpu


COMPUTE_DTYPE = jnp.bfloat16  # MXU input dtype; accumulation stays float32.


def _round_up(x, m):
    return ((x + m - 1) // m) * m


def _minet_tile_kernel(x_ref, w1_ref, b1_ref, w2_ref, b2_ref, w3_ref, b3_ref,
                       fea_ref, tmax_ref, *, n_total, tile_n):
    """One (tile_n, input_dim) slab -> features + padding-masked partial max."""
    # Layer 1: (tile_n, D) @ (D, 256), bf16 MXU inputs, f32 accumulate.
    h1 = jnp.dot(x_ref[...], w1_ref[...], preferred_element_type=jnp.float32)
    h1 = jnp.maximum(h1 + b1_ref[...], 0.0)

    # Layer 2: (tile_n, 256) @ (256, 128).
    h2 = jnp.dot(h1.astype(w2_ref.dtype), w2_ref[...],
                 preferred_element_type=jnp.float32)
    h2 = jnp.maximum(h2 + b2_ref[...], 0.0)

    # Layer 3: (tile_n, 128) @ (128, 64).
    h3 = jnp.dot(h2.astype(w3_ref.dtype), w3_ref[...],
                 preferred_element_type=jnp.float32)
    h3 = jnp.maximum(h3 + b3_ref[...], 0.0)

    # Dropout: eval-mode identity (see TODO at top of file).
    fea_ref[...] = h3.astype(fea_ref.dtype)

    # Partial max over this tile's *valid* rows (padded rows -> -inf).
    rows = (pl.program_id(0) * tile_n
            + jax.lax.broadcasted_iota(jnp.int32, (tile_n, 64), 0))
    masked = jnp.where(rows < n_total, h3, -jnp.inf)
    tmax_ref[...] = jnp.max(masked, axis=0, keepdims=True)[None, :, :]


@functools.partial(jax.jit, static_argnames=("tile_n",))
def minet_forward(x, params, *, tile_n=None):
    """x: (N, input_dim) float32 bag. Returns (Y_prob, Y_hat, fea) like MINet.forward."""
    w1, b1, w2, b2, w3, b3, w4, b4 = params
    n, d = x.shape

    if tile_n is None:
        # >=512 rows per tile fills the 256-wide MXUs on v6e/v7x; tiny bags
        # just use a single 8-aligned tile.
        tile_n = 512 if n >= 512 else _round_up(n, 8)
    tile_n = _round_up(tile_n, 8)
    num_tiles = pl.cdiv(n, tile_n)
    n_pad = num_tiles * tile_n

    x_pad = jnp.pad(x, ((0, n_pad - n), (0, 0))).astype(COMPUTE_DTYPE)
    w1c, w2c, w3c = (w.astype(COMPUTE_DTYPE) for w in (w1, w2, w3))

    flops = 2 * n_pad * (d * 256 + 256 * 128 + 128 * 64)
    bytes_accessed = (
        n_pad * d * 2                                    # x (bf16)
        + (d * 256 + 256 * 128 + 128 * 64) * 2           # resident weights (bf16)
        + (256 + 128 + 64) * 4                           # biases (f32)
        + n_pad * 64 * 4                                 # fea (f32)
        + num_tiles * 64 * 4                             # per-tile maxes (f32)
    )

    const2d = lambda i: (0, 0)
    fea_pad, tile_max = pl.pallas_call(
        functools.partial(_minet_tile_kernel, n_total=n, tile_n=tile_n),
        grid=(num_tiles,),
        in_specs=[
            pl.BlockSpec((tile_n, d), lambda i: (i, 0)),   # x: tiled over instances
            pl.BlockSpec((d, 256), const2d),               # W1 (VMEM-resident)
            pl.BlockSpec((1, 256), const2d),               # b1
            pl.BlockSpec((256, 128), const2d),             # W2
            pl.BlockSpec((1, 128), const2d),               # b2
            pl.BlockSpec((128, 64), const2d),              # W3
            pl.BlockSpec((1, 64), const2d),                # b3
        ],
        out_specs=(
            pl.BlockSpec((tile_n, 64), lambda i: (i, 0)),     # fea
            pl.BlockSpec((1, 1, 64), lambda i: (i, 0, 0)),    # per-tile max
        ),
        out_shape=(
            jax.ShapeDtypeStruct((n_pad, 64), jnp.float32),
            jax.ShapeDtypeStruct((num_tiles, 1, 64), jnp.float32),
        ),
        compiler_params=pltpu.CompilerParams(
            dimension_semantics=("parallel",),
            vmem_limit_bytes=48 * 1024 * 1024,
        ),
        cost_estimate=pl.CostEstimate(
            flops=flops, transcendentals=0, bytes_accessed=bytes_accessed),
    )(x_pad, w1c, b1, w2c, b2, w3c, b3)

    fea = fea_pad[:n]

    # Score pooling ('max' over instances) + Linear(64,out) + sigmoid: a tiny
    # (1,64)@(64,out) op, finished in plain JAX so the grid stays parallel.
    pooled = jnp.max(tile_max, axis=0)                    # (1, 64)
    prob = jax.nn.sigmoid(pooled @ w4 + b4)               # (1, out_dim)
    y_prob = jnp.squeeze(prob)
    y_hat = jnp.squeeze((prob >= 0.5).astype(jnp.float32))
    return y_prob, y_hat, fea


def init_params(key, input_dim, output_dim):
    """Deterministic PyTorch-style (uniform +/- 1/sqrt(fan_in)) init."""
    dims = [(input_dim, 256), (256, 128), (128, 64), (64, output_dim)]
    params = []
    for (fan_in, fan_out) in dims:
        key, kw, kb = jax.random.split(key, 3)
        bound = 1.0 / jnp.sqrt(float(fan_in))
        w = jax.random.uniform(kw, (fan_in, fan_out), jnp.float32, -bound, bound)
        b = jax.random.uniform(kb, (1, fan_out), jnp.float32, -bound, bound)
        params += [w, b]
    return tuple(params)


def reference_forward_f32(x, params):
    """Pure-f32 plain-JAX reference mirroring the PyTorch forward (eval mode)."""
    w1, b1, w2, b2, w3, b3, w4, b4 = params
    h = jnp.maximum(x @ w1 + b1, 0.0)
    h = jnp.maximum(h @ w2 + b2, 0.0)
    h = jnp.maximum(h @ w3 + b3, 0.0)
    pooled = jnp.max(h, axis=0, keepdims=True)
    prob = jax.nn.sigmoid(pooled @ w4 + b4)
    return jnp.squeeze(prob), jnp.squeeze((prob >= 0.5).astype(jnp.float32)), h


def reference_forward_mixed(x, params):
    """Plain-JAX reference mirroring the kernel's bf16-MXU / f32-accumulate path."""
    w1, b1, w2, b2, w3, b3, w4, b4 = params
    cd = COMPUTE_DTYPE
    h = x.astype(cd)
    fea = None
    for w, b in ((w1, b1), (w2, b2), (w3, b3)):
        a = jnp.dot(h, w.astype(cd), preferred_element_type=jnp.float32)
        fea = jnp.maximum(a + b, 0.0)
        h = fea.astype(cd)
    pooled = jnp.max(fea, axis=0, keepdims=True)
    prob = jax.nn.sigmoid(pooled @ w4 + b4)
    return jnp.squeeze(prob), jnp.squeeze((prob >= 0.5).astype(jnp.float32)), fea


if __name__ == "__main__":
    # Small shapes consistent with the module: a bag of N=8 instances,
    # input_dim=32, output_dim=1 (binary MIL classification).
    N, INPUT_DIM, OUTPUT_DIM = 8, 32, 1

    key = jax.random.PRNGKey(0)
    key, kx, kp = jax.random.split(key, 3)

    # PyTorch forward does x.squeeze(0) on a (1, N, D) bag -> build (N, D) directly.
    x = jax.random.normal(kx, (N, INPUT_DIM), jnp.float32)
    params = init_params(kp, INPUT_DIM, OUTPUT_DIM)

    y_prob, y_hat, fea = minet_forward(x, params)
    jax.block_until_ready((y_prob, y_hat, fea))

    m_prob, m_hat, m_fea = reference_forward_mixed(x, params)
    f_prob, f_hat, f_fea = reference_forward_f32(x, params)
    assert fea.shape == (N, 64)
    assert jnp.allclose(fea, m_fea, atol=1e-4, rtol=1e-4)
    assert jnp.allclose(y_prob, m_prob, atol=1e-4, rtol=1e-4)
    # bf16 MXU path stays close to the pure-f32 PyTorch semantics.
    assert jnp.allclose(fea, f_fea, atol=5e-2, rtol=5e-2)
    assert jnp.allclose(y_prob, f_prob, atol=5e-2, rtol=5e-2)
    assert jnp.array_equal(y_hat, jnp.squeeze((y_prob >= 0.5).astype(jnp.float32)))

    # Second check: multi-tile path with padding (N not a multiple of tile_n).
    N2 = 300
    key, kx2 = jax.random.split(key)
    x2 = jax.random.normal(kx2, (N2, INPUT_DIM), jnp.float32)
    y2_prob, y2_hat, fea2 = minet_forward(x2, params, tile_n=128)
    jax.block_until_ready((y2_prob, y2_hat, fea2))
    m2_prob, _, m2_fea = reference_forward_mixed(x2, params)
    assert fea2.shape == (N2, 64)
    assert jnp.allclose(fea2, m2_fea, atol=1e-4, rtol=1e-4)
    assert jnp.allclose(y2_prob, m2_prob, atol=1e-4, rtol=1e-4)

    print("KERNEL_OK")
</pallas_src>

<mosaic_0001>
module attributes {stable_mosaic.version = 11 : i64} {
  func.func @_minet_tile_kernel(%arg0: i32, %arg1: memref<8x32xbf16, #tpu.memory_space<vmem>>, %arg2: memref<32x256xbf16, #tpu.memory_space<vmem>>, %arg3: memref<1x256xf32, #tpu.memory_space<vmem>>, %arg4: memref<256x128xbf16, #tpu.memory_space<vmem>>, %arg5: memref<1x128xf32, #tpu.memory_space<vmem>>, %arg6: memref<128x64xbf16, #tpu.memory_space<vmem>>, %arg7: memref<1x64xf32, #tpu.memory_space<vmem>>, %arg8: memref<8x64xf32, #tpu.memory_space<vmem>>, %arg9: memref<1x1x64xf32, #tpu.memory_space<vmem>>) attributes {dimension_semantics = [#tpu.dimension_semantics<parallel>], iteration_bounds = array<i64: 1>, scalar_prefetch = 0 : i64, scratch_operands = 0 : i64, tpu.core_type = #tpu.core_type<tc>, window_params = [{transform_indices = @transform_0, window_bounds = array<i64: 8, 32>}, {pipeline_mode = #tpu.pipeline_mode<synchronous>, transform_indices = @transform_1, window_bounds = array<i64: 32, 256>}, {pipeline_mode = #tpu.pipeline_mode<synchronous>, transform_indices = @transform_2, window_bounds = array<i64: 1, 256>}, {pipeline_mode = #tpu.pipeline_mode<synchronous>, transform_indices = @transform_3, window_bounds = array<i64: 256, 128>}, {pipeline_mode = #tpu.pipeline_mode<synchronous>, transform_indices = @transform_4, window_bounds = array<i64: 1, 128>}, {pipeline_mode = #tpu.pipeline_mode<synchronous>, transform_indices = @transform_5, window_bounds = array<i64: 128, 64>}, {pipeline_mode = #tpu.pipeline_mode<synchronous>, transform_indices = @transform_6, window_bounds = array<i64: 1, 64>}, {transform_indices = @transform_7, window_bounds = array<i64: 8, 64>}, {transform_indices = @transform_8, window_bounds = array<i64: 1, 1, 64>}]} {
    %c0 = arith.constant 0 : index
    %c0_0 = arith.constant 0 : index
    %0 = vector.load %arg1[%c0, %c0_0] : memref<8x32xbf16, #tpu.memory_space<vmem>>, vector<8x32xbf16>
    %c0_1 = arith.constant 0 : index
    %c0_2 = arith.constant 0 : index
    %1 = vector.load %arg2[%c0_1, %c0_2] : memref<32x256xbf16, #tpu.memory_space<vmem>>, vector<32x256xbf16>
    %cst = arith.constant dense<0.000000e+00> : vector<8x256xf32>
    %2 = tpu.matmul %0, %1, %cst {dimension_numbers = #tpu.dot_dimension_numbers<[1], [0], [0], [1], [0, 0, 1, 1], [], []>} : vector<8x32xbf16>, vector<32x256xbf16>, vector<8x256xf32> -> vector<8x256xf32>
    %c0_3 = arith.constant 0 : index
    %c0_4 = arith.constant 0 : index
    %3 = vector.load %arg3[%c0_3, %c0_4] : memref<1x256xf32, #tpu.memory_space<vmem>>, vector<1x256xf32>
    %4 = vector.broadcast %3 : vector<1x256xf32> to vector<8x256xf32>
    %5 = arith.addf %2, %4 : vector<8x256xf32>
    %cst_5 = arith.constant 0.000000e+00 : f32
    %6 = vector.broadcast %cst_5 : f32 to vector<8x256xf32>
    %7 = arith.maximumf %5, %6 : vector<8x256xf32>
    %8 = arith.truncf %7 : vector<8x256xf32> to vector<8x256xbf16>
    %c0_6 = arith.constant 0 : index
    %c0_7 = arith.constant 0 : index
    %9 = vector.load %arg4[%c0_6, %c0_7] : memref<256x128xbf16, #tpu.memory_space<vmem>>, vector<256x128xbf16>
    %cst_8 = arith.constant dense<0.000000e+00> : vector<8x128xf32>
    %10 = tpu.matmul %8, %9, %cst_8 {dimension_numbers = #tpu.dot_dimension_numbers<[1], [0], [0], [1], [0, 0, 1, 1], [], []>} : vector<8x256xbf16>, vector<256x128xbf16>, vector<8x128xf32> -> vector<8x128xf32>
    %c0_9 = arith.constant 0 : index
    %c0_10 = arith.constant 0 : index
    %11 = vector.load %arg5[%c0_9, %c0_10] : memref<1x128xf32, #tpu.memory_space<vmem>>, vector<1x128xf32>
    %12 = vector.broadcast %11 : vector<1x128xf32> to vector<8x128xf32>
    %13 = arith.addf %10, %12 : vector<8x128xf32>
    %cst_11 = arith.constant 0.000000e+00 : f32
    %14 = vector.broadcast %cst_11 : f32 to vector<8x128xf32>
    %15 = arith.maximumf %13, %14 : vector<8x128xf32>
    %16 = arith.truncf %15 : vector<8x128xf32> to vector<8x128xbf16>
    %c0_12 = arith.constant 0 : index
    %c0_13 = arith.constant 0 : index
    %17 = vector.load %arg6[%c0_12, %c0_13] : memref<128x64xbf16, #tpu.memory_space<vmem>>, vector<128x64xbf16>
    %cst_14 = arith.constant dense<0.000000e+00> : vector<8x64xf32>
    %18 = tpu.matmul %16, %17, %cst_14 {dimension_numbers = #tpu.dot_dimension_numbers<[1], [0], [0], [1], [0, 0, 1, 1], [], []>} : vector<8x128xbf16>, vector<128x64xbf16>, vector<8x64xf32> -> vector<8x64xf32>
    %c0_15 = arith.constant 0 : index
    %c0_16 = arith.constant 0 : index
    %19 = vector.load %arg7[%c0_15, %c0_16] : memref<1x64xf32, #tpu.memory_space<vmem>>, vector<1x64xf32>
    %20 = vector.broadcast %19 : vector<1x64xf32> to vector<8x64xf32>
    %21 = arith.addf %18, %20 : vector<8x64xf32>
    %cst_17 = arith.constant 0.000000e+00 : f32
    %22 = vector.broadcast %cst_17 : f32 to vector<8x64xf32>
    %23 = arith.maximumf %21, %22 : vector<8x64xf32>
    %c0_18 = arith.constant 0 : index
    %c0_19 = arith.constant 0 : index
    %24 = vector.load %arg8[%c0_18, %c0_19] : memref<8x64xf32, #tpu.memory_space<vmem>>, vector<8x64xf32>
    tpu.vector_store %arg8[%c0_18, %c0_19], %23 {strides = array<i32>} : memref<8x64xf32, #tpu.memory_space<vmem>>, vector<8x64xf32>,
    %c8_i32 = arith.constant 8 : i32
    %25 = arith.muli %arg0, %c8_i32 : i32
    %26 = tpu.iota {dimensions = array<i32: 0>} : vector<8x64xi32>
    %27 = vector.broadcast %25 : i32 to vector<8x64xi32>
    %28 = arith.addi %27, %26 : vector<8x64xi32>
    %c8_i32_20 = arith.constant 8 : i32
    %29 = vector.broadcast %c8_i32_20 : i32 to vector<8x64xi32>
    %30 = arith.cmpi slt, %28, %29 : vector<8x64xi32>
    %cst_21 = arith.constant 0xFF800000 : f32
    %31 = vector.broadcast %cst_21 : f32 to vector<8x64xf32>
    %32 = arith.select %30, %23, %31 : vector<8x64xi1>, vector<8x64xf32>
    %cst_22 = arith.constant dense<0xFF800000> : vector<64xf32>
    %33 = vector.multi_reduction <maximumf>, %32, %cst_22 [0] : vector<8x64xf32> to vector<64xf32>
    %34 = vector.shape_cast %33 : vector<64xf32> to vector<1x64xf32>
    %35 = vector.shape_cast %34 : vector<1x64xf32> to vector<1x1x64xf32>
    %c0_23 = arith.constant 0 : index
    %c0_24 = arith.constant 0 : index
    %c0_25 = arith.constant 0 : index
    %36 = vector.load %arg9[%c0_23, %c0_24, %c0_25] : memref<1x1x64xf32, #tpu.memory_space<vmem>>, vector<1x1x64xf32>
    tpu.vector_store %arg9[%c0_23, %c0_24, %c0_25], %35 {strides = array<i32>} : memref<1x1x64xf32, #tpu.memory_space<vmem>>, vector<1x1x64xf32>,
    return
  }
  func.func @transform_0(%arg0: i32) -> (i32, i32) {
    %c0_i32 = arith.constant 0 : i32
    %c0_i32_0 = arith.constant 0 : i32
    return %arg0, %c0_i32 : i32, i32
  }
  func.func @transform_1(%arg0: i32) -> (i32, i32) {
    %c0_i32 = arith.constant 0 : i32
    %c0_i32_0 = arith.constant 0 : i32
    %c0_i32_1 = arith.constant 0 : i32
    return %c0_i32, %c0_i32_0 : i32, i32
  }
  func.func @transform_2(%arg0: i32) -> (i32, i32) {
    %c0_i32 = arith.constant 0 : i32
    %c0_i32_0 = arith.constant 0 : i32
    %c0_i32_1 = arith.constant 0 : i32
    return %c0_i32, %c0_i32_0 : i32, i32
  }
  func.func @transform_3(%arg0: i32) -> (i32, i32) {
    %c0_i32 = arith.constant 0 : i32
    %c0_i32_0 = arith.constant 0 : i32
    %c0_i32_1 = arith.constant 0 : i32
    return %c0_i32, %c0_i32_0 : i32, i32
  }
  func.func @transform_4(%arg0: i32) -> (i32, i32) {
    %c0_i32 = arith.constant 0 : i32
    %c0_i32_0 = arith.constant 0 : i32
    %c0_i32_1 = arith.constant 0 : i32
    return %c0_i32, %c0_i32_0 : i32, i32
  }
  func.func @transform_5(%arg0: i32) -> (i32, i32) {
    %c0_i32 = arith.constant 0 : i32
    %c0_i32_0 = arith.constant 0 : i32
    %c0_i32_1 = arith.constant 0 : i32
    return %c0_i32, %c0_i32_0 : i32, i32
  }
  func.func @transform_6(%arg0: i32) -> (i32, i32) {
    %c0_i32 = arith.constant 0 : i32
    %c0_i32_0 = arith.constant 0 : i32
    %c0_i32_1 = arith.constant 0 : i32
    return %c0_i32, %c0_i32_0 : i32, i32
  }
  func.func @transform_7(%arg0: i32) -> (i32, i32) {
    %c0_i32 = arith.constant 0 : i32
    %c0_i32_0 = arith.constant 0 : i32
    return %arg0, %c0_i32 : i32, i32
  }
  func.func @transform_8(%arg0: i32) -> (i32, i32, i32) {
    %c0_i32 = arith.constant 0 : i32
    %c0_i32_0 = arith.constant 0 : i32
    %c0_i32_1 = arith.constant 0 : i32
    return %arg0, %c0_i32, %c0_i32_0 : i32, i32, i32
  }
}

</mosaic_0001>

<bundles_post_ra>
// kernel: minet_forward.1
= control target key start
LH: loop header
LB: loop body
LE: loop exit
PB: predicated region body
PF: predicated region fallthrough
CT: control target
= control target key end

     0   :  { %v581_v2 = vmov 0   ;;  %vm67_vm0 = vcmask 261120   ;;  %s741_s0 = inlined_call_operand.vmem [shape: bf16[8,32], index: 0, kind: input, shape index: {}]   ;;  %s742_s1 = inlined_call_operand.vmem [shape: bf16[32,256], index: 1, kind: input, shape index: {}]   ;;  %s743_s2 = inlined_call_operand.vmem [shape: f32[1,256], index: 2, kind: input, shape index: {}]   ;;  %s744_s3 = inlined_call_operand.vmem [shape: bf16[256,128], index: 3, kind: input, shape index: {}]   ;;  %s745_s4 = inlined_call_operand.vmem [shape: f32[1,128], index: 4, kind: input, shape index: {}]   ;;  %s746_s5 = inlined_call_operand.vmem [shape: bf16[128,64], index: 5, kind: input, shape index: {}]   ;;  %s747_s6 = inlined_call_operand.vmem [shape: f32[1,64], index: 6, kind: input, shape index: {}]   ;;  %s748_s7 = inlined_call_operand.hbm [shape: f32[8,64], index: 7, kind: output, shape index: {0}]   ;;  %s749_s8 = inlined_call_operand.vmem [shape: f32[1,1,64], index: 8, kind: output, shape index: {1}]  }
   0x1   :  { %v527_v0 = vld [vmem:[%s742_s1 + $0x4] ss:$8 sps:$4 sm:$0xff]   ;;  %v529_v1 = vld [vmem:[%s742_s1] ss:$8 sps:$4 sm:$0xff]   ;;  %103 = vmatprep.mubr.bf16.mxu0 %v581_v2  ;;  %v530_v3 = vld [vmem:[%s742_s1 + $0x14] ss:$8 sps:$4 sm:$0xff]  }
   0x2   :  { %71 = vmatprep.subr.bf16.mxu0 %v527_v0  ;;  %v532_v4 = vld [vmem:[%s742_s1 + $0x10] ss:$8 sps:$4 sm:$0xff]   ;;  %v533_v5 = vld [vmem:[%s744_s3 + $0x40] sm:$0xff]   ;;  %v535_v8 = vld [vmem:[%s744_s3 + $0x48] sm:$0xff]  }
   0x3   :  { %72 = vmatpush1.bf16.msra.mxu0 %v529_v1  ;;  %v534_v6 = vld [vmem:[%s744_s3] sm:$0xff]   ;;  %472 = vmatprep.subr.bf16.mxu1 %v533_v5  ;;  %v536_v9 = vld [vmem:[%s744_s3 + $0x8] sm:$0xff]   ;;  %v537_v10 = vld [vmem:[%s744_s3 + $0x50] sm:$0xff]  }
   0x4   :  { %73 = vmatprep.subr.bf16.mxu0 %v530_v3  ;;  %v30_v7 = vld [vmem:[%s741_s0] sm:$0xf]  ;;  %473 = vmatpush3.bf16.msra.mxu1 %v534_v6  ;;  %v538_v11 = vld [vmem:[%s744_s3 + $0x10] sm:$0xff]   ;;  %v539_v12 = vld [vmem:[%s744_s3 + $0x58] sm:$0xff]  }
   0x5   :  { %474 = vmatprep.subr.bf16.mxu1 %v535_v8  ;;  %v540_v13 = vld [vmem:[%s744_s3 + $0x18] sm:$0xff]   ;;  %v541_v14 = vld [vmem:[%s744_s3 + $0x60] sm:$0xff]   ;;  %v543_v16 = vld [vmem:[%s744_s3 + $0x68] sm:$0xff]  }
   0x6   :  { %v542_v15 = vld [vmem:[%s744_s3 + $0x20] sm:$0xff]   ;;  %v544_v17 = vld [vmem:[%s744_s3 + $0x28] sm:$0xff]  }
   0x7   :  { %74 = vmatpush1.bf16.msra.mxu0 %v532_v4 }
   0x8   :  { %475 = vmatpush3.bf16.msra.mxu1 %v536_v9 }
   0x9   :  { %476 = vmatprep.subr.bf16.mxu1 %v537_v10 }
   0xa   :  { %445 = vmatmul.mubr.msk.bf16.vlgmr.msra.gmra.mrb[0].mxu0 %vm67_vm0, %v30_v7 }
   0xc   :  { %477 = vmatpush3.bf16.msra.mxu1 %v538_v11 }
   0xd   :  { %478 = vmatprep.subr.bf16.mxu1 %v539_v12 }
  0x10   :  { %479 = vmatpush3.bf16.msra.mxu1 %v540_v13 }
  0x11   :  { %480 = vmatprep.subr.bf16.mxu1 %v541_v14 }
  0x14   :  { %481 = vmatpush3.bf16.msra.mxu1 %v542_v15 }
  0x15   :  { %482 = vmatprep.subr.bf16.mxu1 %v543_v16 }
  0x16   :  { %14 = vsyncpa [#allocation3], 0  ;;  %v545_v18 = vld [vmem:[%s744_s3 + $0x70] sm:$0xff]   ;;  %v547_v20 = vld [vmem:[%s744_s3 + $0x78] sm:$0xff]   ;;  %v582_v23 = vmov 0.0   ;;  %v37_v29 = vlaneseq  ;;  %vm583_vm1 = vmmov 0  }
  0x17   :  { %v546_v19 = vld [vmem:[%s744_s3 + $0x30] sm:$0xff]   ;;  %v548_v21 = vld [vmem:[%s744_s3 + $0x38] sm:$0xff]   ;;  %v549_v22 = vld [vmem:[%s746_s5] sm:$0xff]   ;;  %503 = vmatprep.subr.bf16.mxu0 %v582_v23  ;;  %519 = vmatprep.mubr.msk.bf16.mxu0 %vm583_vm1, %v582_v23  ;;  %vm405_vm2 = vcmask 523264  }
  0x18   :  { %483 = vmatpush3.bf16.msra.mxu1 %v544_v17  ;;  %504 = vmatpush3.bf16.msra.mxu0 %v549_v22  ;;  %v550_v24 = vld [vmem:[%s746_s5 + $0x8] sm:$0xff]   ;;  %v551_v25 = vld [vmem:[%s746_s5 + $0x10] sm:$0xff]   ;;  %v552_v26 = vld [vmem:[%s746_s5 + $0x18] sm:$0xff]   ;;  %v38_v30 = vshrl.u32 %v37_v29, 7 }
  0x19   :  { %484 = vmatprep.subr.bf16.mxu1 %v545_v18  ;;  %505 = vmatprep.subr.bf16.mxu0 %v582_v23  ;;  %v553_v27 = vld [vmem:[%s746_s5 + $0x20] sm:$0xff]   ;;  %v554_v28 = vld [vmem:[%s746_s5 + $0x28] sm:$0xff]   ;;  %v555_v46 = vld [vmem:[%s746_s5 + $0x30] sm:$0xff]  }
  0x1a   :  { %v39_v31 = vsub.s32 0, %v38_v30  ;;  %v35_v32 = vld [vmem:[%s743_s2] sm:$0x3]  ;;  %v43_v33 = vsub.s32 1, %v38_v30  ;;  %v556_v47 = vld [vmem:[%s746_s5 + $0x38] sm:$0xff]   ;;  %s584_s5 = smov [#allocation2]  }
  0x1b   :  { %v446_v49 = vld [vmem:[%s745_s4] ss:$0 sm:$0xff]  ;;  %s429_s19 = sshll.u32 %s584_s5, 4  ;;  %s430_s19 = int_to_ptr.vmem [resolvable:$true] %s429_s19 }
  0x1c   :  { %485 = vmatpush3.bf16.msra.mxu1 %v546_v19  ;;  %506 = vmatpush3.bf16.msra.mxu0 %v550_v24  ;;  %v40_v34 = vrot.slane %v35_v32, %v39_v31  ;;  %v44_v35 = vrot.slane %v35_v32, %v43_v33  ;;  %v463_v57 = vld [vmem:[%s747_s6] ss:$0 sm:$0xff]  ;;  %s557_s4 = scalar_lea.vmem %s430_s19, 128  ;;  %p562_p1 = scmp.lt.s32.totalorder %s430_s19, %s430_s19 }
  0x1d   :  { %486 = vmatprep.subr.bf16.mxu1 %v547_v20  ;;  %507 = vmatprep.subr.bf16.mxu0 %v582_v23  ;;  %p558_p0 = scmp.ne.s32.totalorder %s430_s19, %s557_s4  ;;  %p563_p2 = scmp.lt.s32.totalorder %s557_s4, %s557_s4 }
  0x1f   :  { %p564_p3 = por %p563_p2, %p562_p1 }
  0x20   :  { %487 = vmatpush3.bf16.msra.mxu1 %v548_v21  ;;  %508 = vmatpush3.bf16.msra.mxu0 %v551_v25 }
  0x21   :  { %509 = vmatprep.subr.bf16.mxu0 %v582_v23  ;;  %p565_p4 = pnand %p564_p3, %p558_p0 }
  0x24   :  { %510 = vmatpush3.bf16.msra.mxu0 %v552_v26 }
  0x25   :  { %511 = vmatprep.subr.bf16.mxu0 %v582_v23 }
  0x28   :  { %512 = vmatpush3.bf16.msra.mxu0 %v553_v27 }
  0x29   :  { %513 = vmatprep.subr.bf16.mxu0 %v582_v23 }
  0x2c   :  { %514 = vmatpush3.bf16.msra.mxu0 %v554_v28 }
  0x2d   :  { %515 = vmatprep.subr.bf16.mxu0 %v582_v23 }
  0x30   :  { %516 = vmatpush3.bf16.msra.mxu0 %v555_v46 }
  0x31   :  { %517 = vmatprep.subr.bf16.mxu0 %v582_v23 }
  0x34   :  { %518 = vmatpush3.bf16.msra.mxu0 %v556_v47 }
  0xdd   :  { %v105_v36 = vpop.f32.mrb[0].mxu0 }
  0xde   :  { %v106_v37 = vadd.f32 %v105_v36, %v40_v34  ;;  %v107_v38 = vpop.f32.mrb[1].mxu0 }
  0xdf   :  { %v108_v39 = vadd.f32 %v107_v38, %v44_v35  ;;  %v109_v40 = vpop.f32.mrb[2].mxu0 }
  0xe0   :  { %v112_v41 = vmax.f32 %v106_v37, 0.0  ;;  %v110_v42 = vpop.f32.mrb[3].mxu0 }
  0xe1   :  { %v113_v43 = vmax.f32 %v108_v39, 0.0 }
  0xe2   :  { %v114_v45 = vpack.c.bf16 %v112_v41, %v112_v41 }
  0xe3   :  { %v115_v44 = vpack.c.bf16 %v113_v43, %v113_v43 }
  0xe5   :  { %283 = vmatprep.mubr.bf16.mxu1 %v115_v44 }
  0xe6   :  { %284 = vmatmul.mubr.bf16.vlgmr.msra.gmra.mrb[0].mxu1 %v114_v45 }
 0x1b9   :  { %v488_v48 = vpop.f32.mrb[0].mxu1 }
 0x1ba   :  { %v489_v50 = vpop.f32.mrb[1].mxu1 }
 0x1bb   :  { %v490_v51 = vadd.f32 %v489_v50, %v488_v48  ;;  %v491_v52 = vpop.f32.mrb[2].mxu1 }
 0x1bc   :  { %v492_v53 = vpop.f32.mrb[3].mxu1 }
 0x1bd   :  { %v286_v54 = vadd.f32 %v490_v51, %v446_v49 }
 0x1bf   :  { %v291_v55 = vmax.f32 %v286_v54, 0.0 }
 0x1c1   :  { %v292_v56 = vpack.c.bf16 %v291_v55, %v291_v55 }
 0x1c3   :  { %520 = vmatmul.mubr.bf16.vlgmr.msra.gmra.mrb[4].mxu0 %v292_v56 }
 0x296   :  { %v398_v58 = vpop.f32.mrb[4].mxu0 }
 0x297   :  { %v399_v59 = vadd.f32 %v463_v57, %v398_v58  ;;  %v521_v60 = vpop.f32.mrb[5].mxu0 }
 0x298   :  { %v401_v61 = vpop.f32.mrb[6].mxu0 }
 0x299   :  { %v404_v62 = vmax.f32 %v399_v59, 0.0  ;;  %v522_v63 = vpop.f32.mrb[7].mxu0 }
 0x29b   :  { %406 = vst.msk [vmem:[#allocation2] sm:$0xff] %vm405_vm2, %v404_v62  ;;  %v414_v0 = vsel %vm405_vm2, %v404_v62, -inf }
 0x29c   :  { %v415_v1 = vrot.slane %v414_v0, 4 }
 0x29d   :  { %568 = shalt.err (!%p565_p4)
}
 0x29e   :  { %s569_s1 = scalar_lea.hbm %s748_s7, 128 }
 0x29f   :  { %p570_p5 = scmp.ne.s32.totalorder %s748_s7, %s569_s1  ;;  %p573_p6 = scmp.lt.u32.totalorder %s569_s1, %s748_s7 }
 0x2a1   :  { %p575_p7 = pnand %p573_p6, %p570_p5 }
 0x2a3   :  { %578 = shalt.err (!%p575_p7)
}
 0x2a4   :  { %432 = dma.vmem_to_hbm [thread:$0]  %s430_s19, 128, %s748_s7, [#allocation3]   ;;  %v416_v2 = vmax.f32 %v414_v0, %v415_v1  ;;  %vm421_vm3 = vcmask 516096  }
 0x2a6   :  { %v417_v3 = vrot.slane %v416_v2, 2 }
 0x2a8   :  { %v418_v4 = vmax.f32 %v416_v2, %v417_v3 }
 0x2aa   :  { %v419_v5 = vrot.slane %v418_v4, 1 }
 0x2ac   :  { %v420_v6 = vmax.f32 %v418_v4, %v419_v5 }
 0x2ae   :  { %422 = vst.msk [vmem:[%s749_s8] sm:$0x1] %vm421_vm3, %v420_v6 }
 0x2af   :  { %579 = dma.done.wait [#allocation3], 128  }
 0x2b0   :  { %580 = vsyncadd [#allocation3], 4294967168 }
 0x2b1   :  { %440 = vsyncpa [#allocation3], 1 }

</bundles_post_ra>
